<compile_context>
chip_gen: v7x
topology: tpu7x:2x2x1
jax: 0.10.0
libtpu: 0.0.40
codegen_flags: <defaults>
</compile_context>

<pallas_src>
import functools

import jax
import jax.numpy as jnp
from jax.experimental import pallas as pl
from jax.experimental.pallas import tpu as pltpu

BN_EPS = 1e-5
_LANE = 128
_SUBLANE = 8


def _round_up(x, m):
    return (x + m - 1) // m * m


def _pad2(x, rows, cols):
    r, c = x.shape
    return jnp.pad(x, ((0, rows - r), (0, cols - c)))


def _mlp2_kernel(n_valid, h_ref, w1_ref, w2_ref, b2_ref, gb_ref, out_ref, stats_ref):
    """Two-phase fused MLP kernel.

    Grid = (phase, row_tile), both 'arbitrary' (stats scratch carried across steps).
      phase 0: accumulate column sum / sum-of-squares of z = h @ W1.
      phase 1: normalize (folded gamma), ReLU, output Linear, store.
    """
    phase = pl.program_id(0)
    tile = pl.program_id(1)

    @pl.when(jnp.logical_and(phase == 0, tile == 0))
    def _init_stats():
        stats_ref[...] = jnp.zeros_like(stats_ref)

    # Hidden Linear.  The Linear bias is dropped: it is exactly cancelled by the
    # batch-mean subtraction of the following BatchNorm.  bf16 inputs, f32 accumulate.
    z = jnp.dot(h_ref[...], w1_ref[...], preferred_element_type=jnp.float32)

    @pl.when(phase == 0)
    def _accumulate():
        col_sum = jnp.sum(z, axis=0, keepdims=True)
        col_sumsq = jnp.sum(z * z, axis=0, keepdims=True)
        stats_ref[...] += jnp.concatenate([col_sum, col_sumsq], axis=0)

    @pl.when(phase == 1)
    def _normalize_and_output():
        inv_n = jnp.float32(1.0 / n_valid)          # padded rows contributed zero
        mean = stats_ref[0:1, :] * inv_n
        var = jnp.maximum(stats_ref[1:2, :] * inv_n - mean * mean, 0.0)
        inv_std = jax.lax.rsqrt(var + BN_EPS)
        scale = inv_std * gb_ref[0:1, :]             # gamma folded into rsqrt
        shift = gb_ref[1:2, :] - mean * scale        # beta - mean*scale
        x = jnp.maximum(z * scale + shift, 0.0)      # BN + ReLU, all f32
        y = jnp.dot(x.astype(w2_ref.dtype), w2_ref[...],
                    preferred_element_type=jnp.float32) + b2_ref[...]
        out_ref[...] = y.astype(out_ref.dtype)


def mlp_forward(h, params, *, tile_rows=512, matmul_dtype=jnp.bfloat16):
    """h: (N, D_in) f32.  params: see init_params.  Returns (N, D_out) f32."""
    N, D_in = h.shape
    H = params["w1"].shape[1]
    D_out = params["w2"].shape[1]

    d_in_p = _round_up(D_in, _LANE)
    h_p = _round_up(H, _LANE)
    d_out_p = _round_up(D_out, _LANE)

    tile_n = min(_round_up(N, _SUBLANE), _round_up(tile_rows, _SUBLANE))
    n_pad = _round_up(N, tile_n)
    n_tiles = n_pad // tile_n

    # Lane-dense, zero-padded, bf16 operands for the MXU; BN params stay f32.
    h_in = _pad2(h, n_pad, d_in_p).astype(matmul_dtype)
    w1 = _pad2(params["w1"], d_in_p, h_p).astype(matmul_dtype)
    w2 = _pad2(params["w2"], h_p, d_out_p).astype(matmul_dtype)
    b2 = _pad2(params["b2"].reshape(1, D_out).astype(jnp.float32), 1, d_out_p)
    gb = _pad2(jnp.stack([params["bn_gamma"], params["bn_beta"]]).astype(jnp.float32),
               2, h_p)

    # VMEM budget: double-buffered row tiles + resident weights + scratch + headroom,
    # capped well under v7x's 64 MiB physical VMEM (also raises v5e's 16 MiB default).
    bpe = jnp.dtype(matmul_dtype).itemsize
    vmem_est = (
        2 * tile_n * d_in_p * bpe
        + 2 * tile_n * d_out_p * 4
        + 2 * (d_in_p * h_p + h_p * d_out_p) * bpe
        + 2 * (d_out_p + 2 * h_p) * 4
        + 2 * h_p * 4
        + (1 << 20)
    )
    vmem_limit = int(min(max(2 * vmem_est, 8 * 1024 * 1024), 48 * 1024 * 1024))

    out = pl.pallas_call(
        functools.partial(_mlp2_kernel, N),
        out_shape=jax.ShapeDtypeStruct((n_pad, d_out_p), jnp.float32),
        grid_spec=pltpu.PrefetchScalarGridSpec(
            num_scalar_prefetch=0,
            grid=(2, n_tiles),
            in_specs=[
                pl.BlockSpec((tile_n, d_in_p), lambda p, i: (i, 0)),   # h row tile
                pl.BlockSpec((d_in_p, h_p), lambda p, i: (0, 0)),      # W1 (resident)
                pl.BlockSpec((h_p, d_out_p), lambda p, i: (0, 0)),     # W2 (resident)
                pl.BlockSpec((1, d_out_p), lambda p, i: (0, 0)),       # b2
                pl.BlockSpec((2, h_p), lambda p, i: (0, 0)),           # [gamma; beta]
            ],
            # Output block index only advances in phase 1 (p*i == 0 for the whole of
            # phase 0), so nothing is flushed to HBM until real results are written.
            out_specs=pl.BlockSpec((tile_n, d_out_p), lambda p, i: (p * i, 0)),
            scratch_shapes=[pltpu.VMEM((2, h_p), jnp.float32)],        # [sum; sumsq]
        ),
        compiler_params=pltpu.CompilerParams(
            dimension_semantics=("arbitrary", "arbitrary"),
            vmem_limit_bytes=vmem_limit,
        ),
    )(h_in, w1, w2, b2, gb)

    return out[:N, :D_out]


def init_params(key, d_in, hidden, d_out):
    """PyTorch-default init: Linear weights/bias ~ U(+-1/sqrt(fan_in)); BN gamma=1, beta=0."""
    k1, k2, k3, k4 = jax.random.split(key, 4)
    s1 = 1.0 / jnp.sqrt(d_in)
    s2 = 1.0 / jnp.sqrt(hidden)
    return {
        "w1": jax.random.uniform(k1, (d_in, hidden), jnp.float32, -s1, s1),
        # b1 is kept in the params (and used by the reference) but NOT fed to the kernel:
        # a Linear bias immediately followed by training-mode BN is a mathematical no-op.
        "b1": jax.random.uniform(k2, (hidden,), jnp.float32, -s1, s1),
        "bn_gamma": jnp.ones((hidden,), jnp.float32),
        "bn_beta": jnp.zeros((hidden,), jnp.float32),
        "w2": jax.random.uniform(k3, (hidden, d_out), jnp.float32, -s2, s2),
        "b2": jax.random.uniform(k4, (d_out,), jnp.float32, -s2, s2),
    }


def _reference(h, p):
    """Pure-JAX f32 reference of MLP.forward (num_layers=2, training-mode BN)."""
    x = h @ p["w1"] + p["b1"]
    m = x.mean(0, keepdims=True)
    v = ((x - m) ** 2).mean(0, keepdims=True)
    x = (x - m) / jnp.sqrt(v + BN_EPS) * p["bn_gamma"] + p["bn_beta"]
    x = jnp.maximum(x, 0.0)
    return x @ p["w2"] + p["b2"]


if __name__ == "__main__":
    # Small GIN-style node batch: 20 nodes, 32 input features, 64 hidden, 32 output.
    N, D_IN, HIDDEN, D_OUT = 20, 32, 64, 32

    key = jax.random.PRNGKey(0)
    k_h, k_p = jax.random.split(key)
    h = jax.random.normal(k_h, (N, D_IN), jnp.float32)
    params = init_params(k_p, D_IN, HIDDEN, D_OUT)

    # tile_rows=8 forces multiple row tiles so the two-phase accumulator path,
    # row padding (20 -> 24) and the tiled output writes are all exercised.
    out = jax.block_until_ready(mlp_forward(h, params, tile_rows=8))

    ref = _reference(h, params)
    assert out.shape == (N, D_OUT), out.shape
    max_err = float(jnp.max(jnp.abs(out - ref)))
    # bf16 matmuls (f32 accumulation) -> loose-ish tolerance vs the f32 reference.
    assert jnp.allclose(out, ref, atol=5e-2, rtol=5e-2), f"mismatch vs reference, max|err|={max_err}"
    print("KERNEL_OK")
</pallas_src>

<mosaic_0001>
module attributes {stable_mosaic.version = 11 : i64} {
  func.func @_mlp2_kernel(%arg0: i32, %arg1: i32, %arg2: memref<8x128xbf16, #tpu.memory_space<vmem>>, %arg3: memref<128x128xbf16, #tpu.memory_space<vmem>>, %arg4: memref<128x128xbf16, #tpu.memory_space<vmem>>, %arg5: memref<1x128xf32, #tpu.memory_space<vmem>>, %arg6: memref<2x128xf32, #tpu.memory_space<vmem>>, %arg7: memref<8x128xf32, #tpu.memory_space<vmem>>, %arg8: memref<2x128xf32, #tpu.memory_space<vmem>>) attributes {dimension_semantics = [#tpu.dimension_semantics<arbitrary>, #tpu.dimension_semantics<arbitrary>], iteration_bounds = array<i64: 2, 3>, scalar_prefetch = 0 : i64, scratch_operands = 1 : i64, tpu.core_type = #tpu.core_type<tc>, window_params = [{transform_indices = @transform_0, window_bounds = array<i64: 8, 128>}, {pipeline_mode = #tpu.pipeline_mode<synchronous>, transform_indices = @transform_1, window_bounds = array<i64: 128, 128>}, {pipeline_mode = #tpu.pipeline_mode<synchronous>, transform_indices = @transform_2, window_bounds = array<i64: 128, 128>}, {pipeline_mode = #tpu.pipeline_mode<synchronous>, transform_indices = @transform_3, window_bounds = array<i64: 1, 128>}, {pipeline_mode = #tpu.pipeline_mode<synchronous>, transform_indices = @transform_4, window_bounds = array<i64: 2, 128>}, {transform_indices = @transform_5, window_bounds = array<i64: 8, 128>}]} {
    %c0_i32 = arith.constant 0 : i32
    %0 = arith.cmpi eq, %arg0, %c0_i32 : i32
    %c0_i32_0 = arith.constant 0 : i32
    %1 = arith.cmpi eq, %arg1, %c0_i32_0 : i32
    %2 = arith.andi %0, %1 : i1
    %3 = arith.extui %2 : i1 to i32
    %c0_i32_1 = arith.constant 0 : i32
    %4 = arith.cmpi ne, %3, %c0_i32_1 : i32
    scf.if %4 {
      %cst_8 = arith.constant 0.000000e+00 : f32
      %14 = vector.broadcast %cst_8 : f32 to vector<2x128xf32>
      %c0_9 = arith.constant 0 : index
      %c0_10 = arith.constant 0 : index
      %15 = vector.load %arg8[%c0_9, %c0_10] : memref<2x128xf32, #tpu.memory_space<vmem>>, vector<2x128xf32>
      tpu.vector_store %arg8[%c0_9, %c0_10], %14 {strides = array<i32>} : memref<2x128xf32, #tpu.memory_space<vmem>>, vector<2x128xf32>,
    } else {
    }
    %c0 = arith.constant 0 : index
    %c0_2 = arith.constant 0 : index
    %5 = vector.load %arg2[%c0, %c0_2] : memref<8x128xbf16, #tpu.memory_space<vmem>>, vector<8x128xbf16>
    %c0_3 = arith.constant 0 : index
    %c0_4 = arith.constant 0 : index
    %6 = vector.load %arg3[%c0_3, %c0_4] : memref<128x128xbf16, #tpu.memory_space<vmem>>, vector<128x128xbf16>
    %cst = arith.constant dense<0.000000e+00> : vector<8x128xf32>
    %7 = tpu.matmul %5, %6, %cst {dimension_numbers = #tpu.dot_dimension_numbers<[1], [0], [0], [1], [0, 0, 1, 1], [], []>} : vector<8x128xbf16>, vector<128x128xbf16>, vector<8x128xf32> -> vector<8x128xf32>
    %c0_i32_5 = arith.constant 0 : i32
    %8 = arith.cmpi eq, %arg0, %c0_i32_5 : i32
    %9 = arith.extui %8 : i1 to i32
    %c0_i32_6 = arith.constant 0 : i32
    %10 = arith.cmpi ne, %9, %c0_i32_6 : i32
    scf.if %10 {
      %cst_8 = arith.constant dense<0.000000e+00> : vector<128xf32>
      %14 = vector.multi_reduction <add>, %7, %cst_8 [0] : vector<8x128xf32> to vector<128xf32>
      %15 = vector.shape_cast %14 : vector<128xf32> to vector<1x128xf32>
      %16 = arith.mulf %7, %7 : vector<8x128xf32>
      %cst_9 = arith.constant dense<0.000000e+00> : vector<128xf32>
      %17 = vector.multi_reduction <add>, %16, %cst_9 [0] : vector<8x128xf32> to vector<128xf32>
      %18 = vector.shape_cast %17 : vector<128xf32> to vector<1x128xf32>
      %c0_10 = arith.constant 0 : index
      %c0_11 = arith.constant 0 : index
      %19 = vector.load %arg8[%c0_10, %c0_11] : memref<2x128xf32, #tpu.memory_space<vmem>>, vector<2x128xf32>
      %20 = tpu.concatenate %15, %18 in 0 : vector<1x128xf32>, vector<1x128xf32> -> vector<2x128xf32>
      %21 = arith.addf %19, %20 : vector<2x128xf32>
      %c0_12 = arith.constant 0 : index
      %c0_13 = arith.constant 0 : index
      %22 = vector.load %arg8[%c0_12, %c0_13] : memref<2x128xf32, #tpu.memory_space<vmem>>, vector<2x128xf32>
      tpu.vector_store %arg8[%c0_12, %c0_13], %21 {strides = array<i32>} : memref<2x128xf32, #tpu.memory_space<vmem>>, vector<2x128xf32>,
    } else {
    }
    %c1_i32 = arith.constant 1 : i32
    %11 = arith.cmpi eq, %arg0, %c1_i32 : i32
    %12 = arith.extui %11 : i1 to i32
    %c0_i32_7 = arith.constant 0 : i32
    %13 = arith.cmpi ne, %12, %c0_i32_7 : i32
    scf.if %13 {
      %c0_8 = arith.constant 0 : index
      %c0_9 = arith.constant 0 : index
      %14 = vector.load %arg8[%c0_8, %c0_9] : memref<2x128xf32, #tpu.memory_space<vmem>>, vector<1x128xf32>
      %cst_10 = arith.constant 5.000000e-02 : f32
      %15 = vector.broadcast %cst_10 : f32 to vector<1x128xf32>
      %16 = arith.mulf %14, %15 : vector<1x128xf32>
      %c1 = arith.constant 1 : index
      %c0_11 = arith.constant 0 : index
      %17 = vector.load %arg8[%c1, %c0_11] : memref<2x128xf32, #tpu.memory_space<vmem>>, vector<1x128xf32>
      %cst_12 = arith.constant 5.000000e-02 : f32
      %18 = vector.broadcast %cst_12 : f32 to vector<1x128xf32>
      %19 = arith.mulf %17, %18 : vector<1x128xf32>
      %20 = arith.mulf %16, %16 : vector<1x128xf32>
      %21 = arith.subf %19, %20 : vector<1x128xf32>
      %cst_13 = arith.constant 0.000000e+00 : f32
      %22 = vector.broadcast %cst_13 : f32 to vector<1x128xf32>
      %23 = arith.maximumf %21, %22 : vector<1x128xf32>
      %cst_14 = arith.constant 9.99999974E-6 : f32
      %24 = vector.broadcast %cst_14 : f32 to vector<1x128xf32>
      %25 = arith.addf %23, %24 : vector<1x128xf32>
      %26 = math.rsqrt %25 : vector<1x128xf32>
      %c0_15 = arith.constant 0 : index
      %c0_16 = arith.constant 0 : index
      %27 = vector.load %arg6[%c0_15, %c0_16] : memref<2x128xf32, #tpu.memory_space<vmem>>, vector<1x128xf32>
      %28 = arith.mulf %26, %27 : vector<1x128xf32>
      %c1_17 = arith.constant 1 : index
      %c0_18 = arith.constant 0 : index
      %29 = vector.load %arg6[%c1_17, %c0_18] : memref<2x128xf32, #tpu.memory_space<vmem>>, vector<1x128xf32>
      %30 = arith.mulf %16, %28 : vector<1x128xf32>
      %31 = arith.subf %29, %30 : vector<1x128xf32>
      %32 = vector.broadcast %28 : vector<1x128xf32> to vector<8x128xf32>
      %33 = arith.mulf %7, %32 : vector<8x128xf32>
      %34 = vector.broadcast %31 : vector<1x128xf32> to vector<8x128xf32>
      %35 = arith.addf %33, %34 : vector<8x128xf32>
      %cst_19 = arith.constant 0.000000e+00 : f32
      %36 = vector.broadcast %cst_19 : f32 to vector<8x128xf32>
      %37 = arith.maximumf %35, %36 : vector<8x128xf32>
      %38 = arith.truncf %37 : vector<8x128xf32> to vector<8x128xbf16>
      %c0_20 = arith.constant 0 : index
      %c0_21 = arith.constant 0 : index
      %39 = vector.load %arg4[%c0_20, %c0_21] : memref<128x128xbf16, #tpu.memory_space<vmem>>, vector<128x128xbf16>
      %cst_22 = arith.constant dense<0.000000e+00> : vector<8x128xf32>
      %40 = tpu.matmul %38, %39, %cst_22 {dimension_numbers = #tpu.dot_dimension_numbers<[1], [0], [0], [1], [0, 0, 1, 1], [], []>} : vector<8x128xbf16>, vector<128x128xbf16>, vector<8x128xf32> -> vector<8x128xf32>
      %c0_23 = arith.constant 0 : index
      %c0_24 = arith.constant 0 : index
      %41 = vector.load %arg5[%c0_23, %c0_24] : memref<1x128xf32, #tpu.memory_space<vmem>>, vector<1x128xf32>
      %42 = vector.broadcast %41 : vector<1x128xf32> to vector<8x128xf32>
      %43 = arith.addf %40, %42 : vector<8x128xf32>
      %c0_25 = arith.constant 0 : index
      %c0_26 = arith.constant 0 : index
      %44 = vector.load %arg7[%c0_25, %c0_26] : memref<8x128xf32, #tpu.memory_space<vmem>>, vector<8x128xf32>
      tpu.vector_store %arg7[%c0_25, %c0_26], %43 {strides = array<i32>} : memref<8x128xf32, #tpu.memory_space<vmem>>, vector<8x128xf32>,
    } else {
    }
    return
  }
  func.func @transform_0(%arg0: i32, %arg1: i32) -> (i32, i32) {
    %c0_i32 = arith.constant 0 : i32
    %c0_i32_0 = arith.constant 0 : i32
    return %arg1, %c0_i32 : i32, i32
  }
  func.func @transform_1(%arg0: i32, %arg1: i32) -> (i32, i32) {
    %c0_i32 = arith.constant 0 : i32
    %c0_i32_0 = arith.constant 0 : i32
    %c0_i32_1 = arith.constant 0 : i32
    return %c0_i32, %c0_i32_0 : i32, i32
  }
  func.func @transform_2(%arg0: i32, %arg1: i32) -> (i32, i32) {
    %c0_i32 = arith.constant 0 : i32
    %c0_i32_0 = arith.constant 0 : i32
    %c0_i32_1 = arith.constant 0 : i32
    return %c0_i32, %c0_i32_0 : i32, i32
  }
  func.func @transform_3(%arg0: i32, %arg1: i32) -> (i32, i32) {
    %c0_i32 = arith.constant 0 : i32
    %c0_i32_0 = arith.constant 0 : i32
    %c0_i32_1 = arith.constant 0 : i32
    return %c0_i32, %c0_i32_0 : i32, i32
  }
  func.func @transform_4(%arg0: i32, %arg1: i32) -> (i32, i32) {
    %c0_i32 = arith.constant 0 : i32
    %c0_i32_0 = arith.constant 0 : i32
    %c0_i32_1 = arith.constant 0 : i32
    return %c0_i32, %c0_i32_0 : i32, i32
  }
  func.func @transform_5(%arg0: i32, %arg1: i32) -> (i32, i32) {
    %0 = arith.muli %arg0, %arg1 : i32
    %c0_i32 = arith.constant 0 : i32
    %c0_i32_0 = arith.constant 0 : i32
    return %0, %c0_i32 : i32, i32
  }
}

</mosaic_0001>

<bundles_post_ra>
// kernel: tpu_custom_call.1
= control target key start
LH: loop header
LB: loop body
LE: loop exit
PB: predicated region body
PF: predicated region fallthrough
CT: control target
= control target key end

     0   :  { %s1490_s0 = inlined_call_operand.hbm [shape: bf16[24,128], index: 0, kind: input, shape index: {}]   ;;  %s1491_s1 = inlined_call_operand.hbm [shape: bf16[128,128], index: 1, kind: input, shape index: {}]   ;;  %s1492_s2 = inlined_call_operand.hbm [shape: bf16[128,128], index: 2, kind: input, shape index: {}]   ;;  %s1493_s3 = inlined_call_operand.vmem [shape: f32[1,128], index: 3, kind: input, shape index: {}]   ;;  %s1494_s4 = inlined_call_operand.vmem [shape: f32[2,128], index: 4, kind: input, shape index: {}]   ;;  %s1495_s5 = inlined_call_operand.hbm [shape: f32[24,128], index: 5, kind: output, shape index: {}]  }
   0x1   :  { %1507 = sst [smem:[#allocation17_spill]] %s1491_s1 }
   0x2   :  { %1508 = sst [smem:[#allocation18_spill]] %s1492_s2 }
   0x3   :  { %1509 = sst [smem:[#allocation19_spill]] %s1495_s5 }
   0x4   :  { %10 = vsyncpa [#allocation4], 0 }
   0x5   :  { %12 = vsyncpa [#allocation4 + $0x1], 0 }
   0x6   :  { %13 = vsyncpa [#allocation7], 0 }
   0x7   :  { %14 = vsyncpa [#allocation5], 0 }
   0x8   :  { %16 = vsyncpa [#allocation5 + $0x1], 0  ;;  %s1172_s18 = smov 0   ;;  %s1174_s19 = smov 0  }
   0x9   :  { %s1176_s20 = smov 0   ;;  %s1178_s21 = smov 0  }
   0xa   :  { %s1180_s22 = smov 0   ;;  %s1182_s23 = smov 0  }
   0xb   :  { %s1184_s24 = smov 0   ;;  %s1186_s25 = smov 0  }
   0xc   :  { %s1188_s26 = smov 0   ;;  %s1190_s27 = smov 0  }
   0xd   :  { %s1192_s28 = smov 0  }
   0xe LB: > { %1510 = sst [smem:[#allocation13_spill]] %s1089_s18  ;;  %s675_s29 = sadd.s32 4294967295, %s1129_s28   ;;  %s1129_s28 = sphi %s1192_s28, %s22_s28   ;;  %s1125_s27 = sphi %s1190_s27, %s1544_s27   ;;  %s1121_s26 = sphi %s1188_s26, %s1543_s26   ;;  %s1117_s25 = sphi %s1186_s25, %s1542_s25   ;;  %s1113_s24 = sphi %s1184_s24, %s1541_s24   ;;  %s1109_s23 = sphi %s1182_s23, %s1540_s23   ;;  %s1105_s22 = sphi %s1180_s22, %s1539_s22   ;;  %s1101_s21 = sphi %s1178_s21, %s1538_s21   ;;  %s1097_s20 = sphi %s1176_s20, %s1537_s20   ;;  %s1093_s19 = sphi %s1174_s19, %s1536_s19   ;;  %s1089_s18 = sphi %s1172_s18, %s1535_s18  }
   0xf   : > { %s676_s30 = sadd.s32 4294967294, %s1129_s28   ;;  %p54_p0 = scmp.ne.s32.totalorder %s1105_s22, %s1101_s21 }
  0x10   : > { %p1228_p1 = scmp.eq.s32.totalorder %s675_s29, 0  ;;  %p163_p2 = scmp.ne.s32.totalorder %s1097_s20, %s1093_s19 }
  0x11   : > { %p164_p3 = scmp.eq.s32.totalorder %s675_s29, 5  ;;  %p169_p5 = scmp.ne.s32.totalorder %s1093_s19, %s1089_s18 }
  0x12   : > { %s1511_s6 = scalar_select %p1228_p1, 1, 0 }
  0x13   : > { %p1236_p4 = por %p1228_p1, %p54_p0  ;;  %p1242_p6 = por %p164_p3, %p163_p2 }
  0x14   : > { %p170_p7 = scmp.eq.s32.totalorder %s676_s30, 5  ;;  %p677_p8 = scmp.ge.s32.totalorder %s1129_s28, 1 }
  0x15   : > { %s1512_s7 = scalar_select %p1236_p4, 1, 0 }
  0x16   : > { %s1513_s8 = scalar_select %p1242_p6, 1, 0 }
  0x17   : > { %p177_p9 = scmp.lt.s32.totalorder %s1129_s28, 7  ;;  %p1248_p10 = por %p170_p7, %p169_p5 }
  0x18   : > { %1514 = sst [smem:[#allocation14_spill]] %s1513_s8  ;;  %s1131_s11 = smov [#allocation6]  }
  0x19   : > { %s1515_s9 = scalar_select %p1248_p10, 1, 0 }
  0x1a   : > { %p1252_p11 = pnand %p677_p8, %p177_p9  ;;  %s189_s12 = sshll.u32 %s1131_s11, 4  ;;  %s190_s12 = int_to_ptr.vmem [resolvable:$true] %s189_s12 }
  0x1b   : > { %1516 = sst [smem:[#allocation15_spill]] %s1515_s9  ;;  %s1132_s14 = smov [#allocation8]  }
  0x1c   : > { %s1517_s10 = scalar_select %p1252_p11, 1, 0 }
  0x1d   : > { %p781_p12 = pneg %p1252_p11  ;;  %s202_s15 = sshll.u32 %s1132_s14, 4  ;;  %s1264_s15 = int_to_ptr.vmem [resolvable:$true] %s202_s15 }
  0x1e   : > { %s1519_s1 = sld [smem:[#allocation17_spill]] }
  0x1f   : > { %p1260_p13 = pnand %p781_p12, %p1228_p1 }
  0x21   : > { %p919_p2 = pneg %p1260_p13 }
  0x24   : > { %s917_s21 = scalar_lea.hbm %s1519_s1, 1024 }
  0x25   : > { %p918_p0 = scmp.ne.s32.totalorder %s1519_s1, %s917_s21  ;;  %p924_p7 = scmp.lt.u32.totalorder %s917_s21, %s1519_s1 }
  0x27   : > { %p920_p3 = pnand %p919_p2, %p918_p0 }
  0x29   : > { %p921_p5 = pneg %p920_p3 }
  0x2b   : > { %p926_p8 = pnand %p924_p7, %p921_p5 }
  0x2d   : > { %929 = shalt.err (!%p926_p8)
}
  0x2e   : > { %s930_s14 = scalar_lea.vmem %s190_s12, 1024  ;;  %p938_p6 = scmp.lt.s32.totalorder %s190_s12, %s190_s12 }
  0x2f   : > { %p931_p9 = scmp.ne.s32.totalorder %s190_s12, %s930_s14  ;;  %p939_p1 = scmp.lt.s32.totalorder %s930_s14, %s930_s14 }
  0x31   : > { %p933_p12 = pnand %p931_p9, %p919_p2  ;;  %p940_p4 = por %p939_p1, %p938_p6 }
  0x33   : > { %p934_p10 = pneg %p933_p12 }
  0x35   : > { %p941_p11 = pnand %p940_p4, %p934_p10 }
  0x37   : > { %944 = shalt.err (!%p941_p11)
}
  0x38   : > { %s1133_s16 = smov 64   ;;  %s1134_s17 = smov 4  }
  0x39   : > { %784 = dma.hbm_to_vmem [thread:$0]  (!%p1260_p13), %s1519_s1, 1024, %s190_s12, [#allocation7], %s1133_s16, %s1133_s16, %s1134_s17  }
  0x3a   : > { %s1520_s2 = sld [smem:[#allocation18_spill]] }
  0x40   : > { %s945_s11 = scalar_lea.hbm %s1520_s2, 1024 }
  0x41   : > { %p946_p0 = scmp.ne.s32.totalorder %s1520_s2, %s945_s11  ;;  %p952_p6 = scmp.lt.u32.totalorder %s945_s11, %s1520_s2 }
  0x43   : > { %p948_p1 = pnand %p946_p0, %p919_p2 }
  0x45   : > { %p949_p4 = pneg %p948_p1 }
  0x47   : > { %p954_p10 = pnand %p952_p6, %p949_p4 }
  0x49   : > { %957 = shalt.err (!%p954_p10)
}
  0x4a   : > { %s958_s12 = scalar_lea.vmem %s1264_s15, 1024  ;;  %p966_p7 = scmp.lt.s32.totalorder %s1264_s15, %s1264_s15 }
  0x4b   : > { %p959_p11 = scmp.ne.s32.totalorder %s1264_s15, %s958_s12  ;;  %p967_p8 = scmp.lt.s32.totalorder %s958_s12, %s958_s12 }
  0x4d   : > { %p961_p3 = pnand %p959_p11, %p919_p2  ;;  %p968_p9 = por %p967_p8, %p966_p7 }
  0x4f   : > { %p962_p5 = pneg %p961_p3 }
  0x51   : > { %p969_p12 = pnand %p968_p9, %p962_p5 }
  0x53   : > { %972 = shalt.err (!%p969_p12)
}
  0x54   : > { %787 = dma.hbm_to_vmem [thread:$0]  (!%p1260_p13), %s1520_s2, 1024, %s1264_s15, [#allocation7], %s1133_s16, %s1133_s16, %s1134_s17  }
  0x55   : > { %s31_s8 = sadd.s32 1, %s1121_s26  ;;  %s34_s13 = sadd.s32 1, %s1125_s27 }
  0x56   : > { %p32_p2 = scmp.ge.s32.totalorder %s31_s8, 3  ;;  %s41_s9 = sadd.s32 1, %s1109_s23 }
  0x57   : > { %p48_p0 = scmp.ne.s32.totalorder %s1109_s23, %s1105_s22  ;;  %p49_p1 = scmp.eq.s32.totalorder %s1129_s28, 0 }
  0x58   : > { %s1546_s8 = smov (%p32_p2, %s31_s8), 0  ;;  %s1548_s13 = smov (!%p32_p2, %s34_s13), %s1125_s27 }
  0x59   : > { %s38_s21 = ssub.s32 %s1121_s26, %s1546_s8  ;;  %p36_p4 = scmp.ge.s32.totalorder %s1548_s13, 2 }
  0x5a   : > { %p39_p6 = scmp.eq.s32.totalorder %s38_s21, 0  ;;  %p1324_p13 = por %p49_p1, %p48_p0 }
  0x5b   : > { %s148_s16 = smul.u32 %s1121_s26, %s1125_s27  ;;  %s1550_s13 = smov (%p36_p4, %s1548_s13), 0 }
  0x5c   : > { %1522 = sst [smem:[#allocation16_spill]] %s1550_s13  ;;  %s149_s29 = smul.u32 %s1550_s13, %s1546_s8 }
  0x5d   : > { %s1333_s17 = scalar_select %p39_p6, %s1109_s23, %s41_s9  }
  0x5e   : > { %s153_s30 = sadd.s32 1, %s1097_s20  ;;  %p798_p10 = scmp.lt.s32.totalorder %s1129_s28, 6 }
  0x5f   : > { %s222_s11 = sand.u32 1, %s1109_s23   ;;  %s150_s14 = ssub.s32 %s148_s16, %s149_s29 }
  0x60   : > { %p151_p11 = scmp.eq.s32.totalorder %s150_s14, 0  ;;  %s681_s12 = sshll.u32 %s222_s11, 2 }
  0x61   : > { %s682_s5 = sshll.u32 %s1121_s26, 6  ;;  %s226_s9 = scalar_lea.vmem [#allocation3], %s681_s12 }
  0x62   : > { %s1342_s18 = scalar_select %p151_p11, %s1097_s20, %s153_s30  }
  0x63   : > { %s1347_s2 = scalar_lea.hbm %s1490_s0, %s682_s5  ;;  %s233_s13 = sshll.u32 %s226_s9, 4  ;;  %s1349_s13 = int_to_ptr.vmem [resolvable:$true] %s233_s13 }
  0x64   : > { %p1353_p3 = pnand %p798_p10, %p1324_p13  ;;  %s223_s29 = scalar_lea.sflag [#allocation4], %s222_s11 }
  0x65   : > { %s973_s30 = scalar_lea.hbm %s1347_s2, 64  ;;  %s978_s12 = scalar_lea.hbm %s1490_s0, 192 }
  0x66   : > { %p974_p5 = scmp.ne.s32.totalorder %s1347_s2, %s973_s30  ;;  %p975_p7 = pneg %p1353_p3 }
  0x67   : > { %p979_p12 = scmp.lt.u32.totalorder %s1347_s2, %s1490_s0  ;;  %p980_p2 = scmp.lt.u32.totalorder %s978_s12, %s973_s30 }
  0x68   : > { %p976_p8 = pnand %p975_p7, %p974_p5  ;;  %p982_p1 = scmp.lt.u32.totalorder %s973_s30, %s1347_s2 }
  0x69   : > { %p981_p0 = por %p980_p2, %p979_p12 }
  0x6a   : > { %p977_p9 = pneg %p976_p8 }
  0x6b   : > { %p983_p4 = por %p982_p1, %p981_p0 }
  0x6d   : > { %p984_p6 = pnand %p983_p4, %p977_p9 }
  0x6f   : > { %987 = shalt.err (!%p984_p6)
}
  0x70   : > { %s988_s11 = scalar_lea.vmem %s1349_s13, 64  ;;  %s1135_s21 = smov [#allocation3]  }
  0x71   : > { %p989_p13 = scmp.ne.s32.totalorder %s1349_s13, %s988_s11  ;;  %s993_s9 = sshll.u32 %s1135_s21, 4  ;;  %s994_s9 = int_to_ptr.vmem [resolvable:$false] %s993_s9 }
  0x72   : > { %s995_s1 = scalar_lea.vmem %s994_s9, 128  ;;  %p996_p5 = scmp.lt.s32.totalorder %s1349_s13, %s994_s9 }
  0x73   : > { %p991_p10 = pnand %p989_p13, %p975_p7  ;;  %p997_p8 = scmp.lt.s32.totalorder %s995_s1, %s988_s11 }
  0x75   : > { %p992_p11 = pneg %p991_p10  ;;  %p998_p12 = por %p997_p8, %p996_p5 }
  0x77   : > { %p999_p2 = pnand %p998_p12, %p992_p11 }
  0x79   : > { %1002 = shalt.err (!%p999_p2)
}
  0x7a   : > { %791 = dma.hbm_to_vmem [thread:$0]  (!%p1353_p3), %s1347_s2, 64, %s1349_s13, %s223_s29  }
  0x7b   : > { %p1524_p9 = scmp.ne.s32.totalorder %s1517_s10, 0 }
  0x7c   : > { %s244_s30 = sand.u32 (!%p1524_p9), 1, %s1105_s22   ;;  %p1525_p7 = scmp.ne.s32.totalorder (!%p1524_p9), %s1512_s7, 0 }
  0x7d   : > { %242 = sbr.rel (%p1524_p9) target bundleno = 695 (0x2b7), region = 40  ;;  %s1385_s14 = sshll.u32 (!%p1524_p9), %s244_s30, 2 }
  0x7e   : > { %s245_s12 = scalar_lea.sflag (!%p1524_p9), [#allocation4], %s244_s30  ;;  %s248_s15 = scalar_lea.vmem (!%p1524_p9), [#allocation3], %s1385_s14 }
  0x84   : > { %1076 = dma.done.wait (%p1525_p7), %s245_s12, 64  }
  0x85   : > { %1078 = vsyncadd (%p1525_p7), %s245_s12, 4294967232  ;;  %p1526_p0 = scmp.ne.s32.totalorder %s1511_s6, 0 }
  0x87   : > { %1080 = dma.done.wait (%p1526_p0), [#allocation7], 2048  }
  0x88   : > { %1082 = vsyncadd (%p1526_p0), [#allocation7], 4294965248  ;;  %s280_s2 = sand.u32 1, %s1093_s19   ;;  %p285_p3 = scmp.eq.s32.totalorder %s1117_s25, 0 }
  0x89   : > { %s1400_s10 = sshll.u32 %s280_s2, 3  ;;  %p286_p1 = scmp.eq.s32.totalorder %s1113_s24, 0 }
  0x8a   : > { %s282_s7 = scalar_lea.vmem [#allocation9], %s1400_s10 }
  0x8b   : > { %p287_p4 = pnand %p286_p1, %p285_p3 }
  0x8c   : > { %v1136_v0 = vmov (!%p287_p4), 0.0  }
  0x8d   : > { %290 = sbr.rel (%p287_p4) target bundleno = 148 (0x94), region = 56  ;;  %291 = vst [vmem:[#allocation2] sm:$0x3] (!%p287_p4), %v1136_v0 }
  0x94 PF: > { %v899_v1 = vld [vmem:[#allocation6] sm:$0xff]   ;;  %v1137_v2 = vmov 0.0   ;;  %v900_v3 = vld [vmem:[#allocation6 + $0x8] sm:$0xff]   ;;  %vm1138_vm0 = vmmov 0   ;;  %v901_v4 = vld [vmem:[#allocation6 + $0x10] sm:$0xff]   ;;  %p696_p6 = scmp.ne.s32.totalorder %s1117_s25, 0 }
  0x95   : > { %729 = vmatprep.subr.bf16.mxu0 %v1137_v2  ;;  %745 = vmatprep.mubr.msk.bf16.mxu0 %vm1138_vm0, %v1137_v2  ;;  %v902_v5 = vld [vmem:[#allocation6 + $0x18] sm:$0xff]   ;;  %v903_v6 = vld [vmem:[#allocation6 + $0x20] sm:$0xff]   ;;  %v904_v7 = vld [vmem:[#allocation6 + $0x28] sm:$0xff]   ;;  %vm414_vm1 = vcmask (!%p696_p6), 1040384  }
  0x96   : > { %730 = vmatpush3.bf16.msra.mxu0 %v899_v1  ;;  %v905_v8 = vld [vmem:[#allocation6 + $0x30] sm:$0xff]   ;;  %v906_v9 = vld [vmem:[#allocation6 + $0x38] sm:$0xff]  }
  0x97   : > { %731 = vmatprep.subr.bf16.mxu0 %v1137_v2  ;;  %v292_v10 = vld [vmem:[%s248_s15] sm:$0xf]  ;;  %v413_v28 = vld [vmem:[#allocation2] sm:$0x3] (!%p696_p6) }
  0x9a   : > { %732 = vmatpush3.bf16.msra.mxu0 %v900_v3 }
  0x9b   : > { %733 = vmatprep.subr.bf16.mxu0 %v1137_v2 }
  0x9e   : > { %734 = vmatpush3.bf16.msra.mxu0 %v901_v4 }
  0x9f   : > { %735 = vmatprep.subr.bf16.mxu0 %v1137_v2 }
  0xa2   : > { %736 = vmatpush3.bf16.msra.mxu0 %v902_v5 }
  0xa3   : > { %737 = vmatprep.subr.bf16.mxu0 %v1137_v2 }
  0xa6   : > { %738 = vmatpush3.bf16.msra.mxu0 %v903_v6 }
  0xa7   : > { %739 = vmatprep.subr.bf16.mxu0 %v1137_v2 }
  0xaa   : > { %740 = vmatpush3.bf16.msra.mxu0 %v904_v7 }
  0xab   : > { %741 = vmatprep.subr.bf16.mxu0 %v1137_v2 }
  0xae   : > { %742 = vmatpush3.bf16.msra.mxu0 %v905_v8 }
  0xaf   : > { %743 = vmatprep.subr.bf16.mxu0 %v1137_v2 }
  0xb2   : > { %744 = vmatpush3.bf16.msra.mxu0 %v906_v9 }
  0xb5   : > { %746 = vmatmul.mubr.bf16.vlgmr.msra.gmra.mrb[0].mxu0 %v292_v10 }
 0x185   : > { %399 = sbr.rel (%p696_p6) target bundleno = 411 (0x19b), region = 60 }
 0x188   : > { %v1406_v11 = vpop.f32.mrb[0].mxu0 }
 0x189   : > { %v747_v12 = vpop.f32.mrb[1].mxu0  ;;  %v400_v15 = vrot.slane (!%p696_p6), %v1406_v11, 4  ;;  %v406_v16 = vmul.f32 (!%p696_p6), %v1406_v11, %v1406_v11 }
 0x18a   : > { %v394_v13 = vpop.f32.mrb[2].mxu0 }
 0x18b   : > { %v748_v14 = vpop.f32.mrb[3].mxu0  ;;  %v401_v17 = vadd.f32 (!%p696_p6), %v400_v15, %v1406_v11  ;;  %v407_v18 = vrot.slane (!%p696_p6), %v406_v16, 4 }
 0x18d   : > { %v402_v19 = vrot.slane %v401_v17, 2  ;;  %v408_v20 = vadd.f32 %v407_v18, %v406_v16 }
 0x18f   : > { %v403_v21 = vadd.f32 %v402_v19, %v401_v17  ;;  %v409_v22 = vrot.slane %v408_v20, 2 }
 0x191   : > { %v404_v23 = vrot.slane %v403_v21, 1  ;;  %v410_v24 = vadd.f32 %v409_v22, %v408_v20 }
 0x193   : > { %v405_v25 = vadd.f32 %v404_v23, %v403_v21  ;;  %v411_v26 = vrot.slane %v410_v24, 1 }
 0x195   : > { %v412_v27 = vadd.f32 %v411_v26, %v410_v24 }
 0x197   : > { %v415_v29 = vsel %vm414_vm1, %v405_v25, %v412_v27 }
 0x198   : > { %v416_v30 = vadd.f32 %v415_v29, %v413_v28 }
 0x19a   : > { %417 = vst [vmem:[#allocation2] sm:$0x3] %v416_v30 }
 0x19b PF: > { %p697_p13 = scmp.ne.s32.totalorder %s1117_s25, 1 }
 0x19c   : > { %v907_v31 = vld [vmem:[#allocation8] sm:$0xff] (!%p697_p13)   ;;  %v1139_v32 = vmov (!%p697_p13), 0.0   ;;  %v908_v33 = vld [vmem:[#allocation8 + $0x8] sm:$0xff] (!%p697_p13)   ;;  %vm1140_vm2 = vmmov (!%p697_p13), 0   ;;  %v909_v34 = vld [vmem:[#allocation8 + $0x10] sm:$0xff] (!%p697_p13)   ;;  %v436_v46 = vlaneseq (!%p697_p13) }
 0x19d   : > { %421 = sbr.rel (%p697_p13) target bundleno = 668 (0x29c), region = 64  ;;  %749 = vmatprep.subr.bf16.mxu0 (!%p697_p13), %v1139_v32  ;;  %765 = vmatprep.mubr.msk.bf16.mxu0 (!%p697_p13), %vm1140_vm2, %v1139_v32  ;;  %v910_v39 = vld [vmem:[#allocation8 + $0x18] sm:$0xff] (!%p697_p13)   ;;  %v911_v42 = vld [vmem:[#allocation8 + $0x20] sm:$0xff] (!%p697_p13)   ;;  %v912_v45 = vld [vmem:[#allocation8 + $0x28] sm:$0xff] (!%p697_p13)  }
 0x19e   : > { %750 = vmatpush3.bf16.msra.mxu0 (!%p697_p13), %v907_v31  ;;  %v913_v47 = vld [vmem:[#allocation8 + $0x30] sm:$0xff] (!%p697_p13)   ;;  %v437_v48 = vshrl.u32 (!%p697_p13), %v436_v46, 7  ;;  %v914_v49 = vld [vmem:[#allocation8 + $0x38] sm:$0xff] (!%p697_p13)  }
 0x19f   : > { %751 = vmatprep.subr.bf16.mxu0 (!%p697_p13), %v1139_v32  ;;  %v431_v50 = vld [vmem:[%s1494_s4] sm:$0x1] (!%p697_p13)  ;;  %v433_v54 = vld [vmem:[%s1494_s4 + $0x1] sm:$0x1] (!%p697_p13) }
 0x1a0   : > { %v438_v51 = vsub.s32 (!%p697_p13), 0, %v437_v48  ;;  %v698_v63 = vld [vmem:[%s1493_s3] ss:$0 sm:$0xff] (!%p697_p13) }
 0x1a1   : > { %v422_v35 = vld [vmem:[#allocation2] sm:$0x1] (!%p697_p13)  ;;  %v424_v36 = vld [vmem:[#allocation2 + $0x1] sm:$0x1] (!%p697_p13) }
 0x1a2   : > { %752 = vmatpush3.bf16.msra.mxu0 (!%p697_p13), %v908_v33  ;;  %v423_v37 = vmul.f32 (!%p697_p13), 0.05, %v422_v35  ;;  %v425_v38 = vmul.f32 (!%p697_p13), 0.05, %v424_v36 }
 0x1a3   : > { %753 = vmatprep.subr.bf16.mxu0 (!%p697_p13), %v1139_v32 }
 0x1a4   : > { %v426_v40 = vmul.f32 %v423_v37, %v423_v37 }
 0x1a6   : > { %754 = vmatpush3.bf16.msra.mxu0 %v909_v34  ;;  %v427_v41 = vsub.f32 %v425_v38, %v426_v40 }
 0x1a7   : > { %755 = vmatprep.subr.bf16.mxu0 %v1139_v32 }
 0x1a8   : > { %v428_v43 = vmax.f32 %v427_v41, 0.0 }
 0x1aa   : > { %756 = vmatpush3.bf16.msra.mxu0 %v910_v39  ;;  %v429_v44 = vadd.f32 1e-05, %v428_v43 }
 0x1ab   : > { %757 = vmatprep.subr.bf16.mxu0 %v1139_v32 }
 0x1ac   : > { %915 = vrsqrt.f32 %v429_v44 }
 0x1ae   : > { %758 = vmatpush3.bf16.msra.mxu0 %v911_v42 }
 0x1af   : > { %759 = vmatprep.subr.bf16.mxu0 %v1139_v32 }
 0x1b2   : > { %760 = vmatpush3.bf16.msra.mxu0 %v912_v45 }
 0x1b3   : > { %761 = vmatprep.subr.bf16.mxu0 %v1139_v32 }
 0x1b6   : > { %762 = vmatpush3.bf16.msra.mxu0 %v913_v47  ;;  %v916_v52 = vpop.eup %915 }
 0x1b7   : > { %763 = vmatprep.subr.bf16.mxu0 %v1139_v32  ;;  %v432_v53 = vmul.f32 %v916_v52, %v431_v50 }
 0x1b9   : > { %v434_v55 = vmul.f32 %v432_v53, %v423_v37  ;;  %v439_v56 = vrot.slane %v432_v53, %v438_v51 }
 0x1ba   : > { %764 = vmatpush3.bf16.msra.mxu0 %v914_v49 }
 0x1bb   : > { %v435_v57 = vsub.f32 %v433_v54, %v434_v55  ;;  %v440_v58 = vmul.f32 %v439_v56, %v1406_v11 }
 0x1bd   : > { %v444_v59 = vrot.slane %v435_v57, %v438_v51 }
 0x1bf   : > { %v445_v60 = vadd.f32 %v444_v59, %v440_v58 }
 0x1c1   : > { %v446_v61 = vmax.f32 %v445_v60, 0.0 }
 0x1c3   : > { %v447_v62 = vpack.c.bf16 %v446_v61, %v446_v61 }
 0x1c5   : > { %766 = vmatmul.mubr.bf16.vlgmr.msra.gmra.mrb[0].mxu0 %v447_v62 }
 0x298   : > { %v553_v0 = vpop.f32.mrb[0].mxu0 }
 0x299   : > { %v554_v1 = vadd.f32 %v698_v63, %v553_v0  ;;  %v767_v2 = vpop.f32.mrb[1].mxu0 }
 0x29a   : > { %v556_v3 = vpop.f32.mrb[2].mxu0 }
 0x29b   : > { %559 = vst [vmem:[%s282_s7] sm:$0xff] %v554_v1  ;;  %v768_v4 = vpop.f32.mrb[3].mxu0 }
 0x29c PF: > { %s1527_s21 = sld [smem:[#allocation14_spill]]  ;;  %s568_s9 = smul.u32 %s1113_s24, %s1117_s25 }
 0x29d   : > { %s575_s1 = sshll.u32 %s282_s7, 4  ;;  %s1528_s15 = sld [smem:[#allocation19_spill]]  ;;  %s1430_s1 = int_to_ptr.vmem [resolvable:$true] %s575_s1 }
 0x29e   : > { %s708_s30 = sshll.u32 %s568_s9, 7  ;;  %s561_s13 = scalar_lea.sflag [#allocation5], %s280_s2 }
 0x29f   : > { %s1003_s16 = scalar_lea.vmem %s1430_s1, 128  ;;  %s1141_s24 = smov [#allocation9]  }
 0x2a0   : > { %p1004_p10 = scmp.ne.s32.totalorder %s1430_s1, %s1003_s16  ;;  %s1007_s25 = sshll.u32 %s1141_s24, 4  ;;  %s1008_s25 = int_to_ptr.vmem [resolvable:$false] %s1007_s25 }
 0x2a1   : > { %s1009_s10 = scalar_lea.vmem %s1008_s25, 256  ;;  %p1010_p12 = scmp.lt.s32.totalorder %s1430_s1, %s1008_s25 }
 0x2a2   : > { %p1529_p11 = scmp.ne.s32.totalorder %s1527_s21, 0  ;;  %p1011_p2 = scmp.lt.s32.totalorder %s1009_s10, %s1003_s16 }
 0x2a3   : > { %s573_s6 = scalar_lea.hbm %s1528_s15, %s708_s30 }
 0x2a4   : > { %p1005_p5 = pnand %p1004_p10, %p1529_p11  ;;  %p1012_p9 = por %p1011_p2, %p1010_p12 }
 0x2a6   : > { %p1006_p8 = pneg %p1005_p5 }
 0x2a8   : > { %p1013_p7 = pnand %p1012_p9, %p1006_p8 }
 0x2aa   : > { %1016 = shalt.err (!%p1013_p7)
}
 0x2ab   : > { %s1017_s7 = scalar_lea.hbm %s573_s6, 128  ;;  %s1021_s5 = scalar_lea.hbm %s1528_s15, 384 }
 0x2ac   : > { %p1018_p0 = scmp.ne.s32.totalorder %s573_s6, %s1017_s7  ;;  %p1022_p4 = scmp.lt.u32.totalorder %s573_s6, %s1528_s15 }
 0x2ad   : > { %p1023_p6 = scmp.lt.u32.totalorder %s1021_s5, %s1017_s7  ;;  %p1025_p10 = scmp.lt.u32.totalorder %s1017_s7, %s573_s6 }
 0x2ae   : > { %p1019_p3 = pnand %p1018_p0, %p1529_p11 }
 0x2af   : > { %p1024_p13 = por %p1023_p6, %p1022_p4 }
 0x2b0   : > { %p1020_p1 = pneg %p1019_p3 }
 0x2b1   : > { %p1026_p5 = por %p1025_p10, %p1024_p13 }
 0x2b3   : > { %p1027_p8 = pnand %p1026_p5, %p1020_p1 }
 0x2b5   : > { %1030 = shalt.err (!%p1027_p8)
}
 0x2b6   : > { %779 = dma.vmem_to_hbm [thread:$0]  (%p1529_p11), %s1430_s1, 128, %s573_s6, %s561_s13  }
 0x2b7 PF: > { %s1530_s30 = sld [smem:[#allocation13_spill]]  ;;  %s1531_s14 = sld [smem:[#allocation15_spill]] }
 0x2b8   : > { %p801_p12 = scmp.ge.s32.totalorder %s1129_s28, 2 }
 0x2bd   : > { %s587_s12 = sand.u32 1, %s1530_s30   ;;  %p1532_p2 = scmp.ne.s32.totalorder %s1531_s14, 0 }
 0x2be   : > { %s588_s16 = scalar_lea.sflag [#allocation5], %s587_s12 }
 0x2bf   : > { %p793_p9 = pnand %p801_p12, %p1532_p2 }
 0x2c1   : > { %1084 = dma.done.wait (!%p793_p9), %s588_s16, 128  }
 0x2c2   : > { %1086 = vsyncadd (!%p793_p9), %s588_s16, 4294967168  ;;  %s22_s28 = sadd.s32 1, %s1129_s28   ;;  %s1533_s24 = smov %s1342_s18 }
 0x2c3   : > { %p19_p7 = scmp.ge.s32.totalorder %s22_s28, 8   ;;  %s1534_s1 = sld [smem:[#allocation16_spill]] }
 0x2c4   : > { %s1535_s18 = smov %s1093_s19  ;;  %s1536_s19 = smov %s1097_s20 }
 0x2c5   : > { %s1537_s20 = smov %s1533_s24  ;;  %s1538_s21 = smov %s1105_s22 }
 0x2c6   : > { %s1539_s22 = smov %s1109_s23  ;;  %s1540_s23 = smov %s1333_s17 }
 0x2c7   : > { %s1541_s24 = smov %s1121_s26  ;;  %s1542_s25 = smov %s1125_s27 }
 0x2c8   : > { %s1543_s26 = smov %s1546_s8  ;;  %21 = sbr.rel (!%p19_p7) target bundleno = 14 (0xe), region = 105 }
 0x2c9   : > { %s1544_s27 = smov %s1534_s1 }
 0x2cf   :  { %593 = vsyncpa [#allocation4], 1 }
 0x2d0   :  { %595 = vsyncpa [#allocation4 + $0x1], 1 }
 0x2d1   :  { %596 = vsyncpa [#allocation7], 1 }
 0x2d2   :  { %597 = vsyncpa [#allocation5], 1 }
 0x2d3   :  { %599 = vsyncpa [#allocation5 + $0x1], 1 }

</bundles_post_ra>
